<compile_context>
chip_gen: v6e
topology: v6e:2x2x1
jax: 0.10.0
libtpu: 0.0.40
codegen_flags: <defaults>
</compile_context>

<pallas_src>
import jax
import jax.numpy as jnp
from jax.experimental import pallas as pl
from jax.experimental.pallas import tpu as pltpu


def _round_up(a: int, b: int) -> int:
    return -(-a // b) * b


def downsample(x_nchw, weight, bias, *, operand_dtype=jnp.bfloat16,
               out_dtype=None, block_m=None):
    """Equivalent of Downsample.forward.

    x_nchw: (N, C, H, W), weight: (Cout, C, 3, 3), bias: (Cout,)
    operand_dtype: dtype fed to the MXU (bf16 default -- native on v5e/v6e/v7x;
                   accumulation stays f32).  None keeps the input dtype.
    Returns (N, Cout, Ho, Wo) = Conv2d(k=3, s=2, p=0)(F.pad(x, (0,1,0,1))).
    """
    N, C, H, W = x_nchw.shape
    Cout = weight.shape[0]
    assert weight.shape == (Cout, C, 3, 3)
    assert H >= 2 and W >= 2

    Ho = (H - 2) // 2 + 1
    Wo = (W - 2) // 2 + 1
    W1 = Wo + 1                       # row stride in the flattened phase plane
    L = (Ho + 1) * W1                 # source lanes per batch element
    M = Ho * W1                       # flattened output columns (padded width)
    out_dtype = x_nchw.dtype if out_dtype is None else out_dtype

    # Cast FIRST so every subsequent copy moves the narrow dtype.
    xq = x_nchw if operand_dtype is None else x_nchw.astype(operand_dtype)
    wq = weight if operand_dtype is None else weight.astype(operand_dtype)
    in_dt = xq.dtype
    es_in = jnp.dtype(in_dt).itemsize
    es_out = jnp.dtype(out_dtype).itemsize

    # ---- space-to-depth by 2 (the only O(input)-sized wrapper copy) --------
    # Pad so every (row,col)-parity phase has extent (Ho+1, Wo+1); the padding
    # contains the module's right/bottom zero-pad, extra padded entries are
    # never read by valid outputs.
    Hp2, Wp2 = 2 * (Ho + 1), 2 * (Wo + 1)
    xp = jnp.pad(xq, ((0, 0), (0, 0), (0, Hp2 - H), (0, Wp2 - W)))
    phases = [xp[:, :, p::2, q::2] for p in (0, 1) for q in (0, 1)]
    xs = jnp.concatenate(phases, axis=1).reshape(N, 4 * C, L)   # free reshape

    # ---- lane-tile size: multiple of 128, ~1 MiB x-block, scaled with 4C ---
    if block_m is None:
        tm = (1 << 20) // max(1, 4 * C * es_in)
        tm = max(128, min(2048, tm))
    else:
        tm = max(128, int(block_m))
    tm = _round_up(tm, 128)
    tm = min(tm, _round_up(M, 128))
    if N * (-(-M // tm)) < 2 and M > 128:   # keep both v7x TensorCores busy
        tm = _round_up(-(-M // 2), 128)
    TM = tm
    n_tiles = -(-M // TM)

    # ---- halo: first (Wo + 2) source lanes of the *next* tile (tiny) -------
    HW = Wo + 2
    halos = []
    for t in range(n_tiles):
        start = (t + 1) * TM
        if start >= L:
            halos.append(jnp.zeros((N, 4 * C, HW), in_dt))
        else:
            end = min(start + HW, L)
            piece = xs[:, :, start:end]
            if end - start < HW:
                piece = jnp.pad(piece, ((0, 0), (0, 0), (0, HW - (end - start))))
            halos.append(piece)
    xhalo = jnp.stack(halos, axis=1)                 # (N, n_tiles, 4C, HW)

    # ---- fold conv weights per (row-parity, col-parity) group --------------
    # xs channel order is [P00 | P01 | P10 | P11], Ppq[a,b] = xpad[2a+p, 2b+q].
    wa = jnp.concatenate([wq[:, :, 0, 0], wq[:, :, 0, 1],
                          wq[:, :, 1, 0], wq[:, :, 1, 1]], axis=1)  # (Cout,4C)
    w02 = wq[:, :, 0, 2]                                             # (Cout,C)
    w12 = wq[:, :, 1, 2]                                             # (Cout,C)
    wc = jnp.concatenate([wq[:, :, 2, 0], wq[:, :, 2, 1]], axis=1)   # (Cout,2C)
    w22 = wq[:, :, 2, 2]                                             # (Cout,C)
    b2 = bias.reshape(Cout, 1).astype(jnp.float32)

    HWpad = _round_up(HW, 128)

    def kernel(x_ref, h_ref, wa_ref, w02_ref, w12_ref, wc_ref, w22_ref,
               b_ref, o_ref, xf_ref):
        # x_ref: (4C, TM) source lanes of this tile; h_ref: (4C, HW) halo.
        xb = x_ref[...]
        xf_ref[:, 0:TM] = xb                       # aligned VMEM copy
        xf_ref[:, TM:TM + HW] = h_ref[...]         # append halo lanes
        # 5 MXU dots, K totalling exactly 9C, f32 accumulation.
        acc = jnp.dot(wa_ref[...], xb, preferred_element_type=jnp.float32)
        acc += jnp.dot(w02_ref[...], xf_ref[0:C, 1:1 + TM],
                       preferred_element_type=jnp.float32)
        acc += jnp.dot(w12_ref[...], xf_ref[2 * C:3 * C, 1:1 + TM],
                       preferred_element_type=jnp.float32)
        acc += jnp.dot(wc_ref[...], xf_ref[0:2 * C, W1:W1 + TM],
                       preferred_element_type=jnp.float32)
        acc += jnp.dot(w22_ref[...], xf_ref[0:C, W1 + 1:W1 + 1 + TM],
                       preferred_element_type=jnp.float32)
        o_ref[...] = (acc + b_ref[...]).astype(o_ref.dtype)

    # ---- VMEM budget / cost hint -------------------------------------------
    # TODO(synk): for very large C (Cout*9C weights > ~16 MB) stream the weight
    # over a K grid axis instead of keeping it resident (v7x has 64 MiB VMEM).
    vmem_bytes = (2 * 4 * C * (TM + HW) * es_in            # x + halo blocks
                  + 4 * C * (TM + HWpad) * es_in           # assembly scratch
                  + 2 * Cout * TM * es_out                 # output block
                  + 2 * 9 * C * Cout * es_in + 2 * Cout * 4
                  + 4 * Cout * TM * 4)                     # f32 acc temporaries
    vmem_limit = int(min(64 << 20, max(32 << 20, 2 * vmem_bytes)))

    cost = pl.CostEstimate(
        flops=2 * N * M * Cout * 9 * C,
        transcendentals=0,
        bytes_accessed=(xs.size + xhalo.size) * es_in
                       + 9 * C * Cout * es_in + N * Cout * M * es_out)

    out_flat = pl.pallas_call(
        kernel,
        out_shape=jax.ShapeDtypeStruct((N, Cout, M), out_dtype),
        grid=(N, n_tiles),
        in_specs=[
            pl.BlockSpec((pl.Squeezed(), 4 * C, TM), lambda n, m: (n, 0, m)),
            pl.BlockSpec((pl.Squeezed(), pl.Squeezed(), 4 * C, HW),
                         lambda n, m: (n, m, 0, 0)),
            pl.BlockSpec((Cout, 4 * C), lambda n, m: (0, 0)),
            pl.BlockSpec((Cout, C), lambda n, m: (0, 0)),
            pl.BlockSpec((Cout, C), lambda n, m: (0, 0)),
            pl.BlockSpec((Cout, 2 * C), lambda n, m: (0, 0)),
            pl.BlockSpec((Cout, C), lambda n, m: (0, 0)),
            pl.BlockSpec((Cout, 1), lambda n, m: (0, 0)),
        ],
        out_specs=pl.BlockSpec((pl.Squeezed(), Cout, TM), lambda n, m: (n, 0, m)),
        scratch_shapes=[pltpu.VMEM((4 * C, TM + HWpad), in_dt)],
        compiler_params=pltpu.CompilerParams(
            dimension_semantics=("parallel", "parallel"),
            vmem_limit_bytes=vmem_limit),
        cost_estimate=cost,
    )(xs, xhalo, wa, w02, w12, wc, w22, b2)

    # Drop the dead (padded-width) column; this is the only output-side copy.
    return out_flat.reshape(N, Cout, Ho, W1)[:, :, :, :Wo]


if __name__ == "__main__":
    key = jax.random.PRNGKey(0)
    kx, kw, kb = jax.random.split(key, 3)

    N, C, H, W = 2, 4, 16, 16
    x = jax.random.normal(kx, (N, C, H, W), jnp.float32)

    # Deterministic init matching nn.Conv2d parameter shapes (Cout=Cin=C, k=3).
    fan_in = C * 3 * 3
    bound = 1.0 / (fan_in ** 0.5)
    weight = jax.random.uniform(kw, (C, C, 3, 3), jnp.float32, -bound, bound)
    bias = jax.random.uniform(kb, (C,), jnp.float32, -bound, bound)

    # Reference: F.pad(x, (0,1,0,1)) then Conv2d(k=3, stride=2, pad=0).
    xp = jnp.pad(x, ((0, 0), (0, 0), (0, 1), (0, 1)))
    ref = jax.lax.conv_general_dilated(
        xp, weight, window_strides=(2, 2), padding="VALID",
        dimension_numbers=("NCHW", "OIHW", "NCHW"))
    ref = ref + bias[None, :, None, None]

    Ho = (H - 2) // 2 + 1
    Wo = (W - 2) // 2 + 1

    # f32 operands: tight check against the f32 reference.
    out_f32 = jax.block_until_ready(downsample(x, weight, bias, operand_dtype=None))
    assert out_f32.shape == (N, C, Ho, Wo)
    assert jnp.allclose(out_f32, ref, atol=1e-4, rtol=1e-4), \
        f"f32 max abs err {jnp.max(jnp.abs(out_f32 - ref))}"

    # Default path: bf16 MXU operands, f32 accumulation -> loosened tolerance.
    out_bf16 = jax.block_until_ready(downsample(x, weight, bias))
    assert out_bf16.shape == (N, C, Ho, Wo)
    assert jnp.allclose(out_bf16, ref, atol=1e-1, rtol=1e-2), \
        f"bf16 max abs err {jnp.max(jnp.abs(out_bf16 - ref))}"

    print("KERNEL_OK")
</pallas_src>

<mosaic_0001>
module attributes {stable_mosaic.version = 11 : i64} {
  func.func @kernel(%arg0: i32, %arg1: i32, %arg2: memref<1x16x128xf32, #tpu.memory_space<vmem>>, %arg3: memref<1x1x16x10xf32, #tpu.memory_space<vmem>>, %arg4: memref<4x16xf32, #tpu.memory_space<vmem>>, %arg5: memref<4x4xf32, #tpu.memory_space<vmem>>, %arg6: memref<4x4xf32, #tpu.memory_space<vmem>>, %arg7: memref<4x8xf32, #tpu.memory_space<vmem>>, %arg8: memref<4x4xf32, #tpu.memory_space<vmem>>, %arg9: memref<4x1xf32, #tpu.memory_space<vmem>>, %arg10: memref<1x4x128xf32, #tpu.memory_space<vmem>>, %arg11: memref<16x256xf32, #tpu.memory_space<vmem>>) attributes {dimension_semantics = [#tpu.dimension_semantics<parallel>, #tpu.dimension_semantics<parallel>], iteration_bounds = array<i64: 2, 1>, scalar_prefetch = 0 : i64, scratch_operands = 1 : i64, tpu.core_type = #tpu.core_type<tc>, window_params = [{transform_indices = @transform_0, window_bounds = array<i64: 1, 16, 128>}, {transform_indices = @transform_1, window_bounds = array<i64: 1, 1, 16, 10>}, {pipeline_mode = #tpu.pipeline_mode<synchronous>, transform_indices = @transform_2, window_bounds = array<i64: 4, 16>}, {pipeline_mode = #tpu.pipeline_mode<synchronous>, transform_indices = @transform_3, window_bounds = array<i64: 4, 4>}, {pipeline_mode = #tpu.pipeline_mode<synchronous>, transform_indices = @transform_4, window_bounds = array<i64: 4, 4>}, {pipeline_mode = #tpu.pipeline_mode<synchronous>, transform_indices = @transform_5, window_bounds = array<i64: 4, 8>}, {pipeline_mode = #tpu.pipeline_mode<synchronous>, transform_indices = @transform_6, window_bounds = array<i64: 4, 4>}, {pipeline_mode = #tpu.pipeline_mode<synchronous>, transform_indices = @transform_7, window_bounds = array<i64: 4, 1>}, {transform_indices = @transform_8, window_bounds = array<i64: 1, 4, 128>}]} {
    %c0 = arith.constant 0 : index
    %c0_0 = arith.constant 0 : index
    %c0_1 = arith.constant 0 : index
    %0 = vector.load %arg2[%c0, %c0_0, %c0_1] : memref<1x16x128xf32, #tpu.memory_space<vmem>>, vector<1x16x128xf32>
    %1 = vector.shape_cast %0 : vector<1x16x128xf32> to vector<16x128xf32>
    %c0_2 = arith.constant 0 : index
    %c0_3 = arith.constant 0 : index
    %2 = vector.load %arg11[%c0_2, %c0_3] : memref<16x256xf32, #tpu.memory_space<vmem>>, vector<16x128xf32>
    tpu.vector_store %arg11[%c0_2, %c0_3], %1 {strides = array<i32>} : memref<16x256xf32, #tpu.memory_space<vmem>>, vector<16x128xf32>,
    %c0_4 = arith.constant 0 : index
    %c0_5 = arith.constant 0 : index
    %c0_6 = arith.constant 0 : index
    %c0_7 = arith.constant 0 : index
    %3 = vector.load %arg3[%c0_4, %c0_5, %c0_6, %c0_7] : memref<1x1x16x10xf32, #tpu.memory_space<vmem>>, vector<1x1x16x10xf32>
    %4 = vector.shape_cast %3 : vector<1x1x16x10xf32> to vector<16x10xf32>
    %c0_8 = arith.constant 0 : index
    %c128 = arith.constant 128 : index
    %5 = vector.load %arg11[%c0_8, %c128] : memref<16x256xf32, #tpu.memory_space<vmem>>, vector<16x10xf32>
    tpu.vector_store %arg11[%c0_8, %c128], %4 {strides = array<i32>} : memref<16x256xf32, #tpu.memory_space<vmem>>, vector<16x10xf32>,
    %c0_9 = arith.constant 0 : index
    %c0_10 = arith.constant 0 : index
    %6 = vector.load %arg4[%c0_9, %c0_10] : memref<4x16xf32, #tpu.memory_space<vmem>>, vector<4x16xf32>
    %cst = arith.constant dense<0.000000e+00> : vector<4x128xf32>
    %7 = tpu.matmul %6, %1, %cst {dimension_numbers = #tpu.dot_dimension_numbers<[1], [0], [0], [1], [0, 0, 1, 1], [], []>} : vector<4x16xf32>, vector<16x128xf32>, vector<4x128xf32> -> vector<4x128xf32>
    %c0_11 = arith.constant 0 : index
    %c0_12 = arith.constant 0 : index
    %8 = vector.load %arg5[%c0_11, %c0_12] : memref<4x4xf32, #tpu.memory_space<vmem>>, vector<4x4xf32>
    %c0_13 = arith.constant 0 : index
    %c1 = arith.constant 1 : index
    %9 = vector.load %arg11[%c0_13, %c1] : memref<16x256xf32, #tpu.memory_space<vmem>>, vector<4x128xf32>
    %cst_14 = arith.constant dense<0.000000e+00> : vector<4x128xf32>
    %10 = tpu.matmul %8, %9, %cst_14 {dimension_numbers = #tpu.dot_dimension_numbers<[1], [0], [0], [1], [0, 0, 1, 1], [], []>} : vector<4x4xf32>, vector<4x128xf32>, vector<4x128xf32> -> vector<4x128xf32>
    %11 = arith.addf %7, %10 : vector<4x128xf32>
    %c0_15 = arith.constant 0 : index
    %c0_16 = arith.constant 0 : index
    %12 = vector.load %arg6[%c0_15, %c0_16] : memref<4x4xf32, #tpu.memory_space<vmem>>, vector<4x4xf32>
    %c8 = arith.constant 8 : index
    %c1_17 = arith.constant 1 : index
    %13 = vector.load %arg11[%c8, %c1_17] : memref<16x256xf32, #tpu.memory_space<vmem>>, vector<4x128xf32>
    %cst_18 = arith.constant dense<0.000000e+00> : vector<4x128xf32>
    %14 = tpu.matmul %12, %13, %cst_18 {dimension_numbers = #tpu.dot_dimension_numbers<[1], [0], [0], [1], [0, 0, 1, 1], [], []>} : vector<4x4xf32>, vector<4x128xf32>, vector<4x128xf32> -> vector<4x128xf32>
    %15 = arith.addf %11, %14 : vector<4x128xf32>
    %c0_19 = arith.constant 0 : index
    %c0_20 = arith.constant 0 : index
    %16 = vector.load %arg7[%c0_19, %c0_20] : memref<4x8xf32, #tpu.memory_space<vmem>>, vector<4x8xf32>
    %c0_21 = arith.constant 0 : index
    %c9 = arith.constant 9 : index
    %17 = vector.load %arg11[%c0_21, %c9] : memref<16x256xf32, #tpu.memory_space<vmem>>, vector<8x128xf32>
    %cst_22 = arith.constant dense<0.000000e+00> : vector<4x128xf32>
    %18 = tpu.matmul %16, %17, %cst_22 {dimension_numbers = #tpu.dot_dimension_numbers<[1], [0], [0], [1], [0, 0, 1, 1], [], []>} : vector<4x8xf32>, vector<8x128xf32>, vector<4x128xf32> -> vector<4x128xf32>
    %19 = arith.addf %15, %18 : vector<4x128xf32>
    %c0_23 = arith.constant 0 : index
    %c0_24 = arith.constant 0 : index
    %20 = vector.load %arg8[%c0_23, %c0_24] : memref<4x4xf32, #tpu.memory_space<vmem>>, vector<4x4xf32>
    %c0_25 = arith.constant 0 : index
    %c10 = arith.constant 10 : index
    %21 = vector.load %arg11[%c0_25, %c10] : memref<16x256xf32, #tpu.memory_space<vmem>>, vector<4x128xf32>
    %cst_26 = arith.constant dense<0.000000e+00> : vector<4x128xf32>
    %22 = tpu.matmul %20, %21, %cst_26 {dimension_numbers = #tpu.dot_dimension_numbers<[1], [0], [0], [1], [0, 0, 1, 1], [], []>} : vector<4x4xf32>, vector<4x128xf32>, vector<4x128xf32> -> vector<4x128xf32>
    %23 = arith.addf %19, %22 : vector<4x128xf32>
    %c0_27 = arith.constant 0 : index
    %c0_28 = arith.constant 0 : index
    %24 = vector.load %arg9[%c0_27, %c0_28] : memref<4x1xf32, #tpu.memory_space<vmem>>, vector<4x1xf32>
    %25 = vector.broadcast %24 : vector<4x1xf32> to vector<4x128xf32>
    %26 = arith.addf %23, %25 : vector<4x128xf32>
    %c0_29 = arith.constant 0 : index
    %c0_30 = arith.constant 0 : index
    %c0_31 = arith.constant 0 : index
    %27 = vector.load %arg10[%c0_29, %c0_30, %c0_31] : memref<1x4x128xf32, #tpu.memory_space<vmem>>, vector<1x4x128xf32>
    %28 = vector.shape_cast %27 : vector<1x4x128xf32> to vector<4x128xf32>
    %29 = vector.shape_cast %26 : vector<4x128xf32> to vector<1x4x128xf32>
    tpu.vector_store %arg10[%c0_29, %c0_30, %c0_31], %29 {strides = array<i32>} : memref<1x4x128xf32, #tpu.memory_space<vmem>>, vector<1x4x128xf32>,
    return
  }
  func.func @transform_0(%arg0: i32, %arg1: i32) -> (i32, i32, i32) {
    %c0_i32 = arith.constant 0 : i32
    %c0_i32_0 = arith.constant 0 : i32
    return %arg0, %c0_i32, %arg1 : i32, i32, i32
  }
  func.func @transform_1(%arg0: i32, %arg1: i32) -> (i32, i32, i32, i32) {
    %c0_i32 = arith.constant 0 : i32
    %c0_i32_0 = arith.constant 0 : i32
    %c0_i32_1 = arith.constant 0 : i32
    return %arg0, %arg1, %c0_i32, %c0_i32_0 : i32, i32, i32, i32
  }
  func.func @transform_2(%arg0: i32, %arg1: i32) -> (i32, i32) {
    %c0_i32 = arith.constant 0 : i32
    %c0_i32_0 = arith.constant 0 : i32
    %c0_i32_1 = arith.constant 0 : i32
    return %c0_i32, %c0_i32_0 : i32, i32
  }
  func.func @transform_3(%arg0: i32, %arg1: i32) -> (i32, i32) {
    %c0_i32 = arith.constant 0 : i32
    %c0_i32_0 = arith.constant 0 : i32
    %c0_i32_1 = arith.constant 0 : i32
    return %c0_i32, %c0_i32_0 : i32, i32
  }
  func.func @transform_4(%arg0: i32, %arg1: i32) -> (i32, i32) {
    %c0_i32 = arith.constant 0 : i32
    %c0_i32_0 = arith.constant 0 : i32
    %c0_i32_1 = arith.constant 0 : i32
    return %c0_i32, %c0_i32_0 : i32, i32
  }
  func.func @transform_5(%arg0: i32, %arg1: i32) -> (i32, i32) {
    %c0_i32 = arith.constant 0 : i32
    %c0_i32_0 = arith.constant 0 : i32
    %c0_i32_1 = arith.constant 0 : i32
    return %c0_i32, %c0_i32_0 : i32, i32
  }
  func.func @transform_6(%arg0: i32, %arg1: i32) -> (i32, i32) {
    %c0_i32 = arith.constant 0 : i32
    %c0_i32_0 = arith.constant 0 : i32
    %c0_i32_1 = arith.constant 0 : i32
    return %c0_i32, %c0_i32_0 : i32, i32
  }
  func.func @transform_7(%arg0: i32, %arg1: i32) -> (i32, i32) {
    %c0_i32 = arith.constant 0 : i32
    %c0_i32_0 = arith.constant 0 : i32
    %c0_i32_1 = arith.constant 0 : i32
    return %c0_i32, %c0_i32_0 : i32, i32
  }
  func.func @transform_8(%arg0: i32, %arg1: i32) -> (i32, i32, i32) {
    %c0_i32 = arith.constant 0 : i32
    %c0_i32_0 = arith.constant 0 : i32
    return %arg0, %c0_i32, %arg1 : i32, i32, i32
  }
}

</mosaic_0001>

<bundles_post_ra>
// kernel: tpu_custom_call.1
= control target key start
LH: loop header
LB: loop body
LE: loop exit
PB: predicated region body
PF: predicated region fallthrough
CT: control target
= control target key end

     0   :  { %13 = vsyncpa [#allocation4], 0  ;;  %s1307_s0 = inlined_call_operand.vmem [shape: f32[2,16,81], index: 0, kind: input, shape index: {}]   ;;  %s1308_s1 = inlined_call_operand.vmem [shape: f32[2,1,16,10], index: 1, kind: input, shape index: {}]   ;;  %s1309_s2 = inlined_call_operand.vmem [shape: f32[4,16], index: 2, kind: input, shape index: {}]   ;;  %s1310_s3 = inlined_call_operand.vmem [shape: f32[4,4], index: 3, kind: input, shape index: {}]   ;;  %s1311_s4 = inlined_call_operand.vmem [shape: f32[4,4], index: 4, kind: input, shape index: {}]   ;;  %s1312_s5 = inlined_call_operand.vmem [shape: f32[4,8], index: 5, kind: input, shape index: {}]   ;;  %s1313_s6 = inlined_call_operand.vmem [shape: f32[4,4], index: 6, kind: input, shape index: {}]   ;;  %s1314_s7 = inlined_call_operand.vmem [shape: f32[4,1], index: 7, kind: input, shape index: {}]   ;;  %s1315_s8 = inlined_call_operand.hbm [shape: f32[2,4,72], index: 8, kind: output, shape index: {}]  }
   0x1   :  { %15 = vsyncpa [#allocation4 + $0x1], 0  ;;  %s1163_s27 = smov 0   ;;  %s1165_s28 = smov 0  }
   0x2   :  { %s1167_s29 = smov 0   ;;  %s1169_s30 = smov 0  }
   0x3   :  { %s1171_s9 = smov 0   ;;  %s1173_s10 = smov 0  }
   0x4 LB: > { %s909_s11 = sadd.s32 4294967295, %s1109_s10   ;;  %s910_s12 = sadd.s32 4294967294, %s1109_s10   ;;  %s1109_s10 = sphi %s1173_s10, %s21_s10   ;;  %s1105_s9 = sphi %s1171_s9, %s1322_s9   ;;  %s1101_s30 = sphi %s1169_s30, %s1321_s30   ;;  %s1097_s29 = sphi %s1167_s29, %s1320_s29   ;;  %s1093_s28 = sphi %s1165_s28, %s1319_s28   ;;  %s1089_s27 = sphi %s1163_s27, %s1318_s27  }
   0x5   : > { %s33_s13 = sadd.s32 1, %s1105_s9  ;;  %s224_s14 = sadd.s32 1, %s1097_s29 }
   0x6   : > { %p35_p0 = scmp.ge.s32.totalorder %s33_s13, 2  ;;  %p234_p1 = scmp.ne.s32.totalorder %s1097_s29, %s1093_s28 }
   0x7   : > { %p235_p2 = scmp.eq.s32.totalorder %s909_s11, 1  ;;  %p240_p3 = scmp.ne.s32.totalorder %s1093_s28, %s1089_s27 }
   0x8   : > { %s1324_s13 = smov (%p35_p0, %s33_s13), 0  ;;  %p241_p5 = scmp.eq.s32.totalorder %s910_s12, 1 }
   0x9   : > { %p1203_p4 = por %p235_p2, %p234_p1  ;;  %s219_s16 = ssub.s32 %s1105_s9, %s1324_s13 }
   0xa   : > { %p913_p6 = scmp.ge.s32.totalorder %s1109_s10, 1  ;;  %p222_p7 = scmp.eq.s32.totalorder %s219_s16, 0 }
   0xb   : > { %p1210_p8 = por %p241_p5, %p240_p3  ;;  %p300_p9 = scmp.lt.s32.totalorder %s1109_s10, 3 }
   0xc   : > { %s1216_s18 = scalar_select %p222_p7, %s1097_s29, %s224_s14  }
   0xd   : > { %p301_p10 = pnand %p913_p6, %p300_p9 }
   0xe   : > { %p346_p11 = scmp.lt.s32.totalorder (!%p301_p10), %s1101_s30, 1  ;;  %s1113_s14 = smov (!%p301_p10), 127  }
   0xf   : > { %304 = sbr.rel (%p301_p10) target bundleno = 372 (0x174), region = 52  ;;  %s1115_s16 = smov (!%p301_p10), 119  }
  0x10   : > { %s1117_s12 = smov (!%p301_p10), [#allocation3]  }
  0x14   : > { %s347_s19 = scalar_select %p346_p11, %s1101_s30, 1  ;;  %vm369_vm0 = vcmask 80896   ;;  %v1111_v0 = vmov 0.0   ;;  %vm1112_vm1 = vmmov 0   ;;  %v372_v5 = vld [vmem:[%s1309_s2] sm:$0xf] }
  0x15   : > { %944 = vmatprep.subr.mxu0 %v1111_v0  ;;  %949 = vmatprep.subr.mxu1 %v1111_v0  ;;  %vm461_vm2 = vcmask 130048   ;;  %v1114_v10 = vmov 0   ;;  %v791_v12 = vld [vmem:[%s1314_s7] sm:$0xf]  ;;  %vm382_vm3 = vcmask 1039360   ;;  %vm388_vm4 = vcmask 1043456  }
  0x16   : > { %s931_s20 = sshll.u32 %s347_s19, 4  ;;  %946 = vmatprep.mubr.msk.f32.mxu0 %vm1112_vm1, %v1111_v0  ;;  %953 = vmatprep.mubr.msk.f32.mxu1 %vm1112_vm1, %v1111_v0  ;;  %s1116_s19 = smov 118   ;;  %v373_v17 = vld [vmem:[%s1310_s3] sm:$0xf]  ;;  %vm384_vm5 = vcmask 31744   ;;  %vm630_vm6 = vcmask 973824  }
  0x17   : > { %s353_s23 = scalar_lea.vmem %s1307_s0, %s931_s20  ;;  %s362_s26 = scalar_lea.vmem %s1308_s1, %s931_s20  ;;  %1032 = vset.pattern.permute.xlu0 %v1114_v10  ;;  %v535_v22 = vld [vmem:[%s1311_s4] sm:$0xf]  ;;  %vm633_vm7 = vcmask 64512   ;;  %vm713_vm8 = vcmask 965632  }
  0x18   : > { %v364_v1 = vld [vmem:[%s353_s23 + $0x8] sm:$0xff]  ;;  %v363_v2 = vld [vmem:[%s353_s23] sm:$0xff]  ;;  %s928_s20 = sshll.u32 %s1101_s30, 6 }
  0x19   : > { %v368_v3 = vld [vmem:[%s362_s26 + $0x8] sm:$0xff]  ;;  %366 = vst [vmem:[#allocation2 + $0x10] sm:$0xff] %v364_v1  ;;  %365 = vst [vmem:[#allocation2] sm:$0xff] %v363_v2  ;;  %v367_v4 = vld [vmem:[%s362_s26] sm:$0xff]  ;;  %950 = vmatpush3.msra.mxu1 %v364_v1  ;;  %s812_s25 = scalar_lea.hbm %s1315_s8, %s928_s20 }
  0x1a   : > { %371 = vst.msk [vmem:[#allocation2 + $0x18] sm:$0xff] %vm369_vm0, %v368_v3  ;;  %370 = vst.msk [vmem:[#allocation2 + $0x8] sm:$0xff] %vm369_vm0, %v367_v4  ;;  %951 = vmatprep.subr.mxu1 %v1111_v0  ;;  %v621_v23 = vld [vmem:[%s1312_s5] sm:$0xf] }
  0x1b   : > { %952 = vmatpush3.msra.mxu1 %v363_v2  ;;  %v708_v27 = vld [vmem:[%s1313_s6] sm:$0xf] }
  0x1c   : > { %961 = vmatprep.subr.mxu1 %v1111_v0  ;;  %954 = vmatmul.mubr.msk.f32.vlgmr.msra.gmra.mxu1 %vm461_vm2, %v372_v5 }
  0x1d   : > { %963 = vmatprep.mubr.msk.f32.mxu1 %vm1112_vm1, %v1111_v0 }
  0x20   : > { %v536_v6 = vld [vmem:[#allocation2 + $0x10] sm:$0xf]  ;;  %v374_v7 = vld [vmem:[#allocation2] sm:$0xf] }
  0x21   : > { %540 = vrot.lane.b32.xlu1 %v536_v6, %s1113_s14  ;;  %378 = vrot.lane.b32.xlu0 %v374_v7, %s1113_s14  ;;  %v537_v8 = vld [vmem:[#allocation2 + $0x18] sm:$0xf]  ;;  %v375_v9 = vld [vmem:[#allocation2 + $0x8] sm:$0xf] }
  0x22   : > { %v623_v11 = vld [vmem:[#allocation2 + $0x8] sm:$0xff] }
  0x25   : > { %542 = vrot.lane.b32.xlu1 %v537_v8, %s1113_s14  ;;  %380 = vrot.lane.b32.xlu0 %v375_v9, %s1113_s14  ;;  %s1037_s14 = sshll.u32 %s1117_s12, 4  ;;  %s1038_s14 = int_to_ptr.vmem [resolvable:$false] %s1037_s14 }
  0x26   : > { %s1039_s30 = scalar_lea.vmem %s1038_s14, 128 }
  0x29   : > { %628 = vrot.lane.b32.xlu1 %v623_v11, %s1115_s16  ;;  %626 = vrot.lane.b32.xlu0 %v363_v2, %s1115_s16  ;;  %s343_s16 = sand.u32 1, %s1093_s28  }
  0x2a   : > { %s800_s26 = scalar_lea.sflag [#allocation4], %s343_s16 }
  0x2d   : > { %711 = vrot.lane.b32.xlu1 %v375_v9, %s1116_s19  ;;  %709 = vrot.lane.b32.xlu0 %v374_v7, %s1116_s19  ;;  %s914_s19 = sshll.u32 %s343_s16, 2 }
  0x2e   : > { %s345_s21 = scalar_lea.vmem [#allocation3], %s914_s19 }
  0x2f   : > { %s814_s22 = sshll.u32 %s345_s21, 4  ;;  %s815_s22 = int_to_ptr.vmem [resolvable:$true] %s814_s22 }
  0x30   : > { %s1033_s11 = scalar_lea.vmem %s815_s22, 64  ;;  %p1040_p1 = scmp.lt.s32.totalorder %s815_s22, %s1038_s14 }
  0x31   : > { %794 = vperm.xlu0 %1032, %v791_v12   ;;  %p1034_p12 = scmp.ne.s32.totalorder %s815_s22, %s1033_s11  ;;  %p1041_p2 = scmp.lt.s32.totalorder %s1039_s30, %s1033_s11 }
  0x33   : > { %p1035_p13 = pnand %p1034_p12, %p1203_p4  ;;  %p1042_p3 = por %p1041_p2, %p1040_p1 }
  0x35   : > { %p1036_p0 = pneg %p1035_p13 }
  0x37   : > { %p1043_p5 = pnand %p1042_p3, %p1036_p0 }
  0x93   : > { %v541_v13 = vpop.permute.xlu1 %540  ;;  %v379_v14 = vpop.permute.xlu0 %378 }
  0x97   : > { %v543_v15 = vpop.permute.xlu1 %542  ;;  %v381_v16 = vpop.permute.xlu0 %380 }
  0x98   : > { %v383_v18 = vsel %vm382_vm3, %v379_v14, %v381_v16  ;;  %v544_v19 = vsel %vm382_vm3, %v541_v13, %v543_v15 }
  0x99   : > { %945 = vmatpush3.msk.msra.mxu0 %vm388_vm4, %v383_v18 }
  0x9a   : > { %956 = vmatprep.subr.mxu0 %v1111_v0  ;;  %947 = vmatmul.mubr.msk.f32.vlgmr.msra.gmra.mxu0 %vm384_vm5, %v373_v17 }
  0x9b   : > { %v629_v20 = vpop.permute.xlu1 %628  ;;  %957 = vmatpush3.msk.msra.mxu0 %vm388_vm4, %v544_v19  ;;  %v627_v21 = vpop.permute.xlu0 %626  ;;  %958 = vmatprep.mubr.msk.f32.mxu0 %vm1112_vm1, %v1111_v0 }
  0x9c   : > { %v631_v24 = vsel %vm630_vm6, %v627_v21, %v629_v20  ;;  %966 = vmatprep.subr.mxu0 %v1111_v0 }
  0x9d   : > { %962 = vmatpush3.msra.mxu1 %v631_v24 }
  0x9e   : > { %959 = vmatmul.mubr.msk.f32.vlgmr.msra.gmra.mxu0 %vm384_vm5, %v535_v22  ;;  %964 = vmatmul.mubr.msk.f32.vlgmr.msra.gmra.mxu1 %vm633_vm7, %v621_v23 }
  0x9f   : > { %v712_v25 = vpop.permute.xlu1 %711  ;;  %v710_v26 = vpop.permute.xlu0 %709  ;;  %968 = vmatprep.mubr.msk.f32.mxu0 %vm1112_vm1, %v1111_v0 }
  0xa0   : > { %v714_v28 = vsel %vm713_vm8, %v710_v26, %v712_v25 }
  0xa1   : > { %967 = vmatpush3.msk.msra.mxu0 %vm388_vm4, %v714_v28 }
  0xa2   : > { %969 = vmatmul.mubr.msk.f32.vlgmr.msra.gmra.mxu0 %vm384_vm5, %v708_v27 }
  0xac   : > { %v795_v41 = vpop.permute.xlu0 %794 }
  0xdc   : > { %v531_v29 = vpop.f32.mrf.mxu1 }
  0xde   : > { %v955_v30 = vpop.f32.mrf.mxu1 }
 0x15a   : > { %v457_v31 = vpop.f32.mrf.mxu0 }
 0x15b   : > { %v532_v33 = vadd.f32 %v531_v29, %v457_v31 }
 0x15c   : > { %v948_v32 = vpop.f32.mrf.mxu0 }
 0x15e   : > { %v616_v34 = vpop.f32.mrf.mxu0  ;;  %v703_v35 = vpop.f32.mrf.mxu1 }
 0x15f   : > { %v620_v36 = vadd.f32 %v616_v34, %v532_v33 }
 0x160   : > { %v960_v37 = vpop.f32.mrf.mxu0  ;;  %v965_v38 = vpop.f32.mrf.mxu1 }
 0x161   : > { %v707_v39 = vadd.f32 %v703_v35, %v620_v36 }
 0x162   : > { %v786_v40 = vpop.f32.mrf.mxu0 }
 0x163   : > { %v790_v42 = vadd.f32 %v786_v40, %v707_v39 }
 0x164   : > { %v970_v43 = vpop.f32.mrf.mxu0 }
 0x165   : > { %v797_v44 = vadd.f32 %v795_v41, %v790_v42 }
 0x167   : > { %798 = vst [vmem:[%s345_s21] sm:$0xf] %v797_v44 }
 0x168   : > { %1046 = shalt.err (!%p1043_p5)
}
 0x169   : > { %s1047_s19 = scalar_lea.hbm %s812_s25, 64  ;;  %s1051_s21 = scalar_lea.hbm %s1315_s8, 128 }
 0x16a   : > { %p1048_p6 = scmp.ne.s32.totalorder %s812_s25, %s1047_s19  ;;  %p1052_p10 = scmp.lt.s32.totalorder %s812_s25, %s1315_s8 }
 0x16b   : > { %p1053_p11 = scmp.lt.s32.totalorder %s1051_s21, %s1047_s19 }
 0x16c   : > { %p1049_p7 = pnand %p1048_p6, %p1203_p4 }
 0x16d   : > { %p1054_p12 = por %p1053_p11, %p1052_p10 }
 0x16e   : > { %p1050_p9 = pneg %p1049_p7 }
 0x170   : > { %p1055_p13 = pnand %p1054_p12, %p1050_p9 }
 0x172   : > { %1058 = shalt.err (!%p1055_p13)
}
 0x173   : > { %971 = dma.vmem_to_hbm [thread:$0]  (%p1203_p4), %s815_s22, 64, %s812_s25, %s800_s26  }
 0x174 PF: > { %p977_p0 = scmp.ge.s32.totalorder %s1109_s10, 2  ;;  %s826_s11 = sand.u32 1, %s1089_s27  }
 0x175   : > { %s827_s12 = scalar_lea.sflag [#allocation4], %s826_s11 }
 0x176   : > { %p974_p1 = pnand %p977_p0, %p1210_p8 }
 0x178   : > { %p975_p2 = pneg %p974_p1 }
 0x17a   : > { %1084 = dma.done.wait (%p975_p2), %s827_s12, 64  }
 0x17b   : > { %1086 = vsyncadd (%p975_p2), %s827_s12, 4294967232  ;;  %s21_s10 = sadd.s32 1, %s1109_s10   ;;  %s1318_s27 = smov %s1093_s28 }
 0x17c   : > { %p18_p3 = scmp.ge.s32.totalorder %s21_s10, 4   ;;  %s1319_s28 = smov %s1097_s29 }
 0x17d   : > { %s1320_s29 = smov %s1216_s18  ;;  %s1321_s30 = smov %s1105_s9 }
 0x17e   : > { %s1322_s9 = smov %s1324_s13  ;;  %20 = sbr.rel (!%p18_p3) target bundleno = 4 (0x4), region = 90 }
 0x183   :  { %832 = vsyncpa [#allocation4], 1 }
 0x184   :  { %834 = vsyncpa [#allocation4 + $0x1], 1 }

</bundles_post_ra>
